<compile_context>
chip_gen: v6e
topology: v6e:2x2x1
jax: 0.10.0
libtpu: 0.0.40
codegen_flags: <defaults>
</compile_context>

<pallas_src>
import jax
import jax.numpy as jnp
from jax.experimental import pallas as pl
from jax.experimental.pallas import tpu as pltpu


def _exam_kernel(e_ref, k_ref, wcomb_ref, b1_ref, w2e_ref, b2_ref,
                 agreg_ref, prob_ref, cls_ref):
    """One batch tile.

    e_ref / k_ref : (Bb, R, T*D) bf16   lane-dense: lanes = T*D, region on sublanes
    wcomb_ref     : (T*D, C*H) f32      Wcomb[t*D+d, c*H+h] = Wi[c,d] * W1[h,t]
    b1_ref        : (1, C*H)   f32      b1 tiled per class
    w2e_ref       : (C*H, C)   f32      block-diagonal aggregation2 weight
    b2_ref        : (1, 1)     f32
    outputs       : agreg (Bb,C) f32, prob (Bb,C) f32, cls (Bb,1) int32
    """
    e = e_ref[...].astype(jnp.float32)
    k = k_ref[...].astype(jnp.float32)

    # Inter = relu( max over region of E*K )  -> (Bb, T*D), t-major / d-minor.
    inter = jnp.maximum(jnp.max(e * k, axis=1), 0.0)

    # aggregation1(interaction(Inter)) + b1, relu.  (dropout: identity in eval)
    a1 = jnp.dot(inter, wcomb_ref[...], preferred_element_type=jnp.float32) + b1_ref[...]
    a1 = jnp.maximum(a1, 0.0)

    # aggregation2 per class -> logits (Bb, C)
    agreg = jnp.dot(a1, w2e_ref[...], preferred_element_type=jnp.float32) + b2_ref[...]
    agreg_ref[...] = agreg

    # softmax over classes
    m = jnp.max(agreg, axis=1, keepdims=True)
    ex = jnp.exp(agreg - m)
    prob_ref[...] = ex / jnp.sum(ex, axis=1, keepdims=True)

    # argmax over the logits (softmax is monotone, identical to torch.max(prob,1)[1]);
    # first-max-index tie breaking.
    c = agreg.shape[1]
    col = jax.lax.broadcasted_iota(jnp.int32, agreg.shape, dimension=1)
    cand = jnp.where(agreg >= m, col, jnp.int32(c))
    cls_ref[...] = jnp.min(cand, axis=1, keepdims=True)


def exam_pallas(E, K, Wi, W1, b1, W2, b2, *, block_b=8):
    """EXAM forward from the embedded tensors.

    E, K : (B, T, R, D) f32   (T = entire, R = region_size, D = embedding_size)
    Wi   : (C, D)             interaction weight (no bias)
    W1   : (H, T), b1: (H,)   aggregation1
    W2   : (1, H), b2: (1,)   aggregation2
    returns  Agreg (B, C) f32, prob (B, C) f32, class (B,) int32
    """
    B, T, R, D = E.shape
    C = Wi.shape[0]
    H = W1.shape[0]

    # ---- layout plumbing (wrapper) ----
    # Lane-dense E/K: (B, R, T*D), streamed in bf16.
    El = jnp.transpose(E, (0, 2, 1, 3)).reshape(B, R, T * D).astype(jnp.bfloat16)
    Kl = jnp.transpose(K, (0, 2, 1, 3)).reshape(B, R, T * D).astype(jnp.bfloat16)

    # Fuse interaction (D->C) with aggregation1 (T->H): both linear, disjoint
    # contraction axes, no nonlinearity between them -> one (T*D, C*H) matrix.
    Wcomb = jnp.einsum('cd,ht->tdch', Wi, W1).reshape(T * D, C * H).astype(jnp.float32)
    b1t = jnp.tile(b1.reshape(1, H), (C, 1)).reshape(1, C * H).astype(jnp.float32)
    w2 = W2.reshape(H).astype(jnp.float32)
    W2e = (jnp.eye(C, dtype=jnp.float32)[:, None, :] * w2[None, :, None]).reshape(C * H, C)
    b2m = b2.reshape(1, 1).astype(jnp.float32)

    # ---- batch tiling ----
    if B <= block_b:
        Bb = B                         # single grid step; blocks equal full dims
    else:
        Bb = block_b
        assert Bb % 8 == 0, "batch tile must be a multiple of 8 when tiling"
    Bpad = ((B + Bb - 1) // Bb) * Bb
    if Bpad != B:
        El = jnp.pad(El, ((0, Bpad - B), (0, 0), (0, 0)))
        Kl = jnp.pad(Kl, ((0, Bpad - B), (0, 0), (0, 0)))

    grid = (Bpad // Bb,)
    # VMEM per step is tiny at these shapes (KBs); for much larger T*D add a
    # T grid axis with an f32 accumulator / raise vmem_limit_bytes per the
    # generation's VMEM budget.
    agreg, prob, cls = pl.pallas_call(
        _exam_kernel,
        grid=grid,
        in_specs=[
            pl.BlockSpec((Bb, R, T * D), lambda i: (i, 0, 0)),
            pl.BlockSpec((Bb, R, T * D), lambda i: (i, 0, 0)),
            pl.BlockSpec((T * D, C * H), lambda i: (0, 0)),
            pl.BlockSpec((1, C * H), lambda i: (0, 0)),
            pl.BlockSpec((C * H, C), lambda i: (0, 0)),
            pl.BlockSpec((1, 1), lambda i: (0, 0)),
        ],
        out_specs=[
            pl.BlockSpec((Bb, C), lambda i: (i, 0)),
            pl.BlockSpec((Bb, C), lambda i: (i, 0)),
            pl.BlockSpec((Bb, 1), lambda i: (i, 0)),
        ],
        out_shape=[
            jax.ShapeDtypeStruct((Bpad, C), jnp.float32),
            jax.ShapeDtypeStruct((Bpad, C), jnp.float32),
            jax.ShapeDtypeStruct((Bpad, 1), jnp.int32),
        ],
        compiler_params=pltpu.CompilerParams(
            dimension_semantics=("parallel",),   # batch-tile axis -> megacore on v7x
        ),
    )(El, Kl, Wcomb, b1t, W2e, b2m)

    return agreg[:B], prob[:B], cls[:B, 0]


def build_E_K(tokens, emb_region, emb_word, region_radius, region_size, embedding_size):
    """Plain-JAX glue reproducing the module's embedding / window logic exactly,
    including the contiguous-reshape reinterpretation of E."""
    B, L = tokens.shape
    entire = L - 2 * region_radius

    # K = embedding_region(trimed_seq).reshape(B, entire, R, D)
    trimed = tokens[:, region_radius:L - region_radius]                  # (B, entire)
    K = emb_region[trimed].reshape(B, entire, region_size, embedding_size)

    # E: window stack -> transpose -> transpose -> embed -> row-major reinterpretation
    windows = jnp.stack(
        [tokens[:, nu - region_radius:nu - region_radius + region_size]
         for nu in range(region_radius, L - region_radius)], axis=0)     # (entire, B, R)
    Eidx = jnp.transpose(windows, (1, 0, 2))                             # (B, entire, R)
    Eidx = jnp.transpose(Eidx, (0, 2, 1))                                # (B, R, entire)
    E = emb_word[Eidx]                                                   # (B, R, entire, D)
    E = E.reshape(B, entire, region_size, embedding_size)                # reinterpret (as torch .reshape does)
    return E, K


def xavier_uniform(key, shape):
    fan_out, fan_in = shape
    bound = (6.0 / (fan_in + fan_out)) ** 0.5
    return jax.random.uniform(key, shape, jnp.float32, -bound, bound)


if __name__ == "__main__":
    # Small shapes consistent with the module.
    voca_size = 50
    embedding_size = 32      # D
    region_size = 5          # R
    num_classes = 4          # C
    max_length = 12          # L
    batch = 16               # B  (two batch tiles of 8 -> 2 parallel grid steps)
    region_radius = region_size // 2
    entire = max_length - 2 * region_radius     # T = 8
    hidden = 2 * max_length                     # H = 24

    key = jax.random.PRNGKey(0)
    ks = jax.random.split(key, 8)

    # Deterministic "checkpoint" matching the module's init scheme.
    tokens = jax.random.randint(ks[0], (batch, max_length), 1, voca_size, dtype=jnp.int32)
    emb_region = jax.random.uniform(ks[1], (voca_size, region_size * embedding_size),
                                    jnp.float32, -0.01, 0.01)
    emb_word = jax.random.uniform(ks[2], (voca_size, embedding_size), jnp.float32, -0.01, 0.01)
    Wi = jax.random.uniform(ks[3], (num_classes, embedding_size), jnp.float32, -0.01, 0.01)
    W1 = xavier_uniform(ks[4], (hidden, entire))
    b1 = jax.random.uniform(ks[5], (hidden,), jnp.float32,
                            -1.0 / entire ** 0.5, 1.0 / entire ** 0.5)
    W2 = xavier_uniform(ks[6], (1, hidden))
    b2 = jax.random.uniform(ks[7], (1,), jnp.float32,
                            -1.0 / hidden ** 0.5, 1.0 / hidden ** 0.5)

    E, K = build_E_K(tokens, emb_region, emb_word,
                     region_radius, region_size, embedding_size)

    agreg, prob, cls = exam_pallas(E, K, Wi, W1, b1, W2, b2, block_b=8)
    jax.block_until_ready((agreg, prob, cls))

    # ---- pure-JAX f32 reference of the torch forward (eval: dropout = identity) ----
    B, T, R, D = E.shape
    IR = jax.nn.relu(jnp.max(E * K, axis=2))                            # (B, T, D)
    X = (IR.reshape(-1, D) @ Wi.T).reshape(B, T, num_classes)           # interaction
    Xp = jnp.transpose(X, (0, 2, 1)).reshape(B * num_classes, T)
    A1 = jax.nn.relu(Xp @ W1.T + b1)                                    # aggregation1
    agreg_ref = (A1 @ W2.T + b2).reshape(B, num_classes)                # aggregation2
    prob_ref = jax.nn.softmax(agreg_ref, axis=1)
    cls_ref = jnp.argmax(agreg_ref, axis=1).astype(jnp.int32)

    assert agreg.shape == (batch, num_classes)
    assert prob.shape == (batch, num_classes)
    assert cls.shape == (batch,)
    assert jnp.allclose(agreg, agreg_ref, atol=1e-3, rtol=1e-3)
    assert jnp.allclose(prob, prob_ref, atol=1e-3, rtol=1e-3)

    # Argmax: exact against the kernel's own logits (validates the epilogue).
    assert jnp.array_equal(cls, jnp.argmax(agreg, axis=1).astype(jnp.int32))
    # Against the reference only where the top-2 logit gap is above numerical
    # noise: with random-init weights the class logits differ only at ~1e-6,
    # so cross-implementation argmax is not numerically meaningful below that.
    srt = jnp.sort(agreg_ref, axis=1)
    clear = (srt[:, -1] - srt[:, -2]) > 1e-4
    assert bool(jnp.all(jnp.where(clear, cls == cls_ref, True)))

    print("KERNEL_OK")
</pallas_src>

<mosaic_0001>
module attributes {stable_mosaic.version = 11 : i64} {
  func.func @_exam_kernel(%arg0: i32, %arg1: memref<8x5x256xbf16, #tpu.memory_space<vmem>>, %arg2: memref<8x5x256xbf16, #tpu.memory_space<vmem>>, %arg3: memref<256x96xf32, #tpu.memory_space<vmem>>, %arg4: memref<1x96xf32, #tpu.memory_space<vmem>>, %arg5: memref<96x4xf32, #tpu.memory_space<vmem>>, %arg6: memref<1x1xf32, #tpu.memory_space<vmem>>, %arg7: memref<8x4xf32, #tpu.memory_space<vmem>>, %arg8: memref<8x4xf32, #tpu.memory_space<vmem>>, %arg9: memref<8x1xi32, #tpu.memory_space<vmem>>) attributes {dimension_semantics = [#tpu.dimension_semantics<parallel>], iteration_bounds = array<i64: 2>, scalar_prefetch = 0 : i64, scratch_operands = 0 : i64, tpu.core_type = #tpu.core_type<tc>, window_params = [{transform_indices = @transform_0, window_bounds = array<i64: 8, 5, 256>}, {transform_indices = @transform_1, window_bounds = array<i64: 8, 5, 256>}, {pipeline_mode = #tpu.pipeline_mode<synchronous>, transform_indices = @transform_2, window_bounds = array<i64: 256, 96>}, {pipeline_mode = #tpu.pipeline_mode<synchronous>, transform_indices = @transform_3, window_bounds = array<i64: 1, 96>}, {pipeline_mode = #tpu.pipeline_mode<synchronous>, transform_indices = @transform_4, window_bounds = array<i64: 96, 4>}, {pipeline_mode = #tpu.pipeline_mode<synchronous>, transform_indices = @transform_5, window_bounds = array<i64: 1, 1>}, {transform_indices = @transform_6, window_bounds = array<i64: 8, 4>}, {transform_indices = @transform_7, window_bounds = array<i64: 8, 4>}, {transform_indices = @transform_8, window_bounds = array<i64: 8, 1>}]} {
    %c0 = arith.constant 0 : index
    %c0_0 = arith.constant 0 : index
    %c0_1 = arith.constant 0 : index
    %0 = vector.load %arg1[%c0, %c0_0, %c0_1] : memref<8x5x256xbf16, #tpu.memory_space<vmem>>, vector<8x5x256xbf16>
    %1 = arith.extf %0 : vector<8x5x256xbf16> to vector<8x5x256xf32>
    %c0_2 = arith.constant 0 : index
    %c0_3 = arith.constant 0 : index
    %c0_4 = arith.constant 0 : index
    %2 = vector.load %arg2[%c0_2, %c0_3, %c0_4] : memref<8x5x256xbf16, #tpu.memory_space<vmem>>, vector<8x5x256xbf16>
    %3 = arith.extf %2 : vector<8x5x256xbf16> to vector<8x5x256xf32>
    %4 = arith.mulf %1, %3 : vector<8x5x256xf32>
    %cst = arith.constant dense<0xFF800000> : vector<8x256xf32>
    %5 = vector.multi_reduction <maximumf>, %4, %cst [1] : vector<8x5x256xf32> to vector<8x256xf32>
    %cst_5 = arith.constant 0.000000e+00 : f32
    %6 = vector.broadcast %cst_5 : f32 to vector<8x256xf32>
    %7 = arith.maximumf %5, %6 : vector<8x256xf32>
    %c0_6 = arith.constant 0 : index
    %c0_7 = arith.constant 0 : index
    %8 = vector.load %arg3[%c0_6, %c0_7] : memref<256x96xf32, #tpu.memory_space<vmem>>, vector<256x96xf32>
    %cst_8 = arith.constant dense<0.000000e+00> : vector<8x96xf32>
    %9 = tpu.matmul %7, %8, %cst_8 {dimension_numbers = #tpu.dot_dimension_numbers<[1], [0], [0], [1], [0, 0, 1, 1], [], []>} : vector<8x256xf32>, vector<256x96xf32>, vector<8x96xf32> -> vector<8x96xf32>
    %c0_9 = arith.constant 0 : index
    %c0_10 = arith.constant 0 : index
    %10 = vector.load %arg4[%c0_9, %c0_10] : memref<1x96xf32, #tpu.memory_space<vmem>>, vector<1x96xf32>
    %11 = vector.broadcast %10 : vector<1x96xf32> to vector<8x96xf32>
    %12 = arith.addf %9, %11 : vector<8x96xf32>
    %cst_11 = arith.constant 0.000000e+00 : f32
    %13 = vector.broadcast %cst_11 : f32 to vector<8x96xf32>
    %14 = arith.maximumf %12, %13 : vector<8x96xf32>
    %c0_12 = arith.constant 0 : index
    %c0_13 = arith.constant 0 : index
    %15 = vector.load %arg5[%c0_12, %c0_13] : memref<96x4xf32, #tpu.memory_space<vmem>>, vector<96x4xf32>
    %cst_14 = arith.constant dense<0.000000e+00> : vector<8x4xf32>
    %16 = tpu.matmul %14, %15, %cst_14 {dimension_numbers = #tpu.dot_dimension_numbers<[1], [0], [0], [1], [0, 0, 1, 1], [], []>} : vector<8x96xf32>, vector<96x4xf32>, vector<8x4xf32> -> vector<8x4xf32>
    %c0_15 = arith.constant 0 : index
    %c0_16 = arith.constant 0 : index
    %17 = vector.load %arg6[%c0_15, %c0_16] : memref<1x1xf32, #tpu.memory_space<vmem>>, vector<1x1xf32>
    %18 = vector.broadcast %17 : vector<1x1xf32> to vector<8x4xf32>
    %19 = arith.addf %16, %18 : vector<8x4xf32>
    %c0_17 = arith.constant 0 : index
    %c0_18 = arith.constant 0 : index
    %20 = vector.load %arg7[%c0_17, %c0_18] : memref<8x4xf32, #tpu.memory_space<vmem>>, vector<8x4xf32>
    tpu.vector_store %arg7[%c0_17, %c0_18], %19 {strides = array<i32>} : memref<8x4xf32, #tpu.memory_space<vmem>>, vector<8x4xf32>,
    %cst_19 = arith.constant dense<0xFF800000> : vector<8xf32>
    %21 = vector.multi_reduction <maximumf>, %19, %cst_19 [1] : vector<8x4xf32> to vector<8xf32>
    %22 = vector.shape_cast %21 : vector<8xf32> to vector<8x1xf32>
    %23 = vector.broadcast %22 : vector<8x1xf32> to vector<8x4xf32>
    %24 = arith.subf %19, %23 : vector<8x4xf32>
    %25 = math.exp %24 : vector<8x4xf32>
    %cst_20 = arith.constant dense<0.000000e+00> : vector<8xf32>
    %26 = vector.multi_reduction <add>, %25, %cst_20 [1] : vector<8x4xf32> to vector<8xf32>
    %27 = vector.shape_cast %26 : vector<8xf32> to vector<8x1xf32>
    %28 = vector.broadcast %27 : vector<8x1xf32> to vector<8x4xf32>
    %29 = arith.divf %25, %28 : vector<8x4xf32>
    %c0_21 = arith.constant 0 : index
    %c0_22 = arith.constant 0 : index
    %30 = vector.load %arg8[%c0_21, %c0_22] : memref<8x4xf32, #tpu.memory_space<vmem>>, vector<8x4xf32>
    tpu.vector_store %arg8[%c0_21, %c0_22], %29 {strides = array<i32>} : memref<8x4xf32, #tpu.memory_space<vmem>>, vector<8x4xf32>,
    %31 = tpu.iota {dimensions = array<i32: 1>} : vector<8x4xi32>
    %32 = vector.broadcast %22 : vector<8x1xf32> to vector<8x4xf32>
    %33 = arith.cmpf oge, %19, %32 : vector<8x4xf32>
    %c4_i32 = arith.constant 4 : i32
    %34 = vector.broadcast %c4_i32 : i32 to vector<8x4xi32>
    %35 = arith.select %33, %31, %34 : vector<8x4xi1>, vector<8x4xi32>
    %cst_23 = arith.constant dense<2147483647> : vector<8xi32>
    %36 = vector.multi_reduction <minsi>, %35, %cst_23 [1] : vector<8x4xi32> to vector<8xi32>
    %37 = vector.shape_cast %36 : vector<8xi32> to vector<8x1xi32>
    %c0_24 = arith.constant 0 : index
    %c0_25 = arith.constant 0 : index
    %38 = vector.load %arg9[%c0_24, %c0_25] : memref<8x1xi32, #tpu.memory_space<vmem>>, vector<8x1xi32>
    tpu.vector_store %arg9[%c0_24, %c0_25], %37 {strides = array<i32>} : memref<8x1xi32, #tpu.memory_space<vmem>>, vector<8x1xi32>,
    return
  }
  func.func @transform_0(%arg0: i32) -> (i32, i32, i32) {
    %c0_i32 = arith.constant 0 : i32
    %c0_i32_0 = arith.constant 0 : i32
    %c0_i32_1 = arith.constant 0 : i32
    return %arg0, %c0_i32, %c0_i32_0 : i32, i32, i32
  }
  func.func @transform_1(%arg0: i32) -> (i32, i32, i32) {
    %c0_i32 = arith.constant 0 : i32
    %c0_i32_0 = arith.constant 0 : i32
    %c0_i32_1 = arith.constant 0 : i32
    return %arg0, %c0_i32, %c0_i32_0 : i32, i32, i32
  }
  func.func @transform_2(%arg0: i32) -> (i32, i32) {
    %c0_i32 = arith.constant 0 : i32
    %c0_i32_0 = arith.constant 0 : i32
    %c0_i32_1 = arith.constant 0 : i32
    return %c0_i32, %c0_i32_0 : i32, i32
  }
  func.func @transform_3(%arg0: i32) -> (i32, i32) {
    %c0_i32 = arith.constant 0 : i32
    %c0_i32_0 = arith.constant 0 : i32
    %c0_i32_1 = arith.constant 0 : i32
    return %c0_i32, %c0_i32_0 : i32, i32
  }
  func.func @transform_4(%arg0: i32) -> (i32, i32) {
    %c0_i32 = arith.constant 0 : i32
    %c0_i32_0 = arith.constant 0 : i32
    %c0_i32_1 = arith.constant 0 : i32
    return %c0_i32, %c0_i32_0 : i32, i32
  }
  func.func @transform_5(%arg0: i32) -> (i32, i32) {
    %c0_i32 = arith.constant 0 : i32
    %c0_i32_0 = arith.constant 0 : i32
    %c0_i32_1 = arith.constant 0 : i32
    return %c0_i32, %c0_i32_0 : i32, i32
  }
  func.func @transform_6(%arg0: i32) -> (i32, i32) {
    %c0_i32 = arith.constant 0 : i32
    %c0_i32_0 = arith.constant 0 : i32
    return %arg0, %c0_i32 : i32, i32
  }
  func.func @transform_7(%arg0: i32) -> (i32, i32) {
    %c0_i32 = arith.constant 0 : i32
    %c0_i32_0 = arith.constant 0 : i32
    return %arg0, %c0_i32 : i32, i32
  }
  func.func @transform_8(%arg0: i32) -> (i32, i32) {
    %c0_i32 = arith.constant 0 : i32
    %c0_i32_0 = arith.constant 0 : i32
    return %arg0, %c0_i32 : i32, i32
  }
}

</mosaic_0001>

<bundles_post_ra>
// kernel: tpu_custom_call.1
= control target key start
LH: loop header
LB: loop body
LE: loop exit
PB: predicated region body
PF: predicated region fallthrough
CT: control target
= control target key end

     0   :  { %s1128_s29 = smov 0   ;;  %s1441_s0 = inlined_call_operand.vmem [shape: bf16[16,5,256], index: 0, kind: input, shape index: {}]   ;;  %s1442_s1 = inlined_call_operand.vmem [shape: bf16[16,5,256], index: 1, kind: input, shape index: {}]   ;;  %s1443_s2 = inlined_call_operand.vmem [shape: f32[256,96], index: 2, kind: input, shape index: {}]   ;;  %s1444_s3 = inlined_call_operand.vmem [shape: f32[1,96], index: 3, kind: input, shape index: {}]   ;;  %s1445_s4 = inlined_call_operand.vmem [shape: f32[96,4], index: 4, kind: input, shape index: {}]   ;;  %s1446_s5 = inlined_call_operand.<no memory space> [shape: f32[1,1], index: 5, kind: input, shape index: {}]   ;;  %s1447_s6 = inlined_call_operand.vmem [shape: f32[16,4], index: 6, kind: output, shape index: {0}]   ;;  %s1448_s7 = inlined_call_operand.vmem [shape: f32[16,4], index: 7, kind: output, shape index: {1}]   ;;  %s1449_s8 = inlined_call_operand.vmem [shape: s32[16,1], index: 8, kind: output, shape index: {2}]  }
   0x1   :  { %v14_v0 = vstv %s1446_s5 }
   0x2   :  { %15 = vst [vmem:[#allocation2] sm:$0x1] %v14_v0 }
   0x3 LB: > { %s1134_s30 = sadd.s32 4294967295, %s1075_s29   ;;  %p961_p0 = scmp.ge.s32.totalorder %s1075_s29, 1  ;;  %s1075_s29 = sphi %s1128_s29, %s21_s29  }
   0x4   : > { %p283_p1 = scmp.lt.s32.totalorder %s1075_s29, 3 }
   0x6   : > { %p284_p2 = pnand %p961_p0, %p283_p1 }
   0x7   : > { %s962_s14 = sshll.u32 (!%p284_p2), %s1134_s30, 3  ;;  %p345_p4 = scmp.lt.s32.totalorder (!%p284_p2), %s1134_s30, 1 }
   0x8   : > { %287 = sbr.rel (%p284_p2) target bundleno = 897 (0x381), region = 44  ;;  %p332_p3 = scmp.lt.s32.totalorder (!%p284_p2), %s962_s14, 15 }
   0xd   : > { %v581_v1 = vld [vmem:[%s1443_s2 + $0xf8] sm:$0xff]  ;;  %v580_v3 = vld [vmem:[%s1443_s2 + $0xf0] sm:$0xff]  ;;  %v579_v5 = vld [vmem:[%s1443_s2 + $0xe8] sm:$0xff]  ;;  %s1451_s14 = smov (!%p332_p3, %s962_s14), 15  ;;  %v1077_v8 = vmov 0.0   ;;  %vm421_vm0 = vcmask 1044480  }
   0xe   : > { %v565_v2 = vld [vmem:[%s1443_s2 + $0x78] sm:$0xff]  ;;  %978 = vmatprep.subr.mxu0 %v581_v1  ;;  %v564_v4 = vld [vmem:[%s1443_s2 + $0x70] sm:$0xff]  ;;  %v563_v6 = vld [vmem:[%s1443_s2 + $0x68] sm:$0xff]  ;;  %1026 = vmatprep.subr.mxu1 %v1077_v8  ;;  %s976_s25 = sshll.u32 %s1451_s14, 3  ;;  %vm605_vm1 = vcmask 1041409   ;;  %vm607_vm2 = vcmask 1042434  }
   0xf   : > { %979 = vmatpush3.msra.mxu0 %v565_v2  ;;  %v578_v7 = vld [vmem:[%s1443_s2 + $0xe0] sm:$0xff]  ;;  %v577_v10 = vld [vmem:[%s1443_s2 + $0xd8] sm:$0xff]  ;;  %s1173_s11 = scalar_lea.vmem %s1441_s0, %s976_s25  ;;  %v576_v12 = vld [vmem:[%s1443_s2 + $0xd0] sm:$0xff]  ;;  %s1193_s24 = scalar_lea.vmem %s1442_s1, %s976_s25  ;;  %vm609_vm3 = vcmask 1043459   ;;  %vm611_vm4 = vcmask 1044484   ;;  %vm613_vm5 = vcmask 1045509  }
  0x10   : > { %980 = vmatprep.subr.mxu0 %v580_v3  ;;  %v562_v9 = vld [vmem:[%s1443_s2 + $0x60] sm:$0xff]  ;;  %v561_v11 = vld [vmem:[%s1443_s2 + $0x58] sm:$0xff]  ;;  %v560_v13 = vld [vmem:[%s1443_s2 + $0x50] sm:$0xff]  ;;  %vm615_vm6 = vcmask 1046534   ;;  %vm617_vm7 = vcmask 1047559   ;;  %vm1078_vm8 = vmmov 0  }
  0x11   : > { %981 = vmatpush3.msra.mxu0 %v564_v4  ;;  %v575_v14 = vld [vmem:[%s1443_s2 + $0xc8] sm:$0xff]  ;;  %v574_v16 = vld [vmem:[%s1443_s2 + $0xc0] sm:$0xff]  ;;  %v1205_v20 = vld [vmem:[%s1173_s11 + $0x10] sm:$0x77]  ;;  %1050 = vmatprep.mubr.msk.f32.mxu1 %vm1078_vm8, %v1077_v8  ;;  %vm721_vm9 = vcmask 785408   ;;  %s1453_s30 = smov (!%p345_p4, %s1134_s30), 1 }
  0x12   : > { %982 = vmatprep.subr.mxu0 %v579_v5  ;;  %v559_v15 = vld [vmem:[%s1443_s2 + $0x48] sm:$0xff]  ;;  %v1196_v17 = vld [vmem:[%s1173_s11] sm:$0x77]  ;;  %v1208_v21 = vld [vmem:[%s1173_s11 + $0x18] sm:$0x77]  ;;  %v370_v29 = vunpack.c.h.bf16 %v1205_v20  ;;  %v369_v39 = vunpack.c.l.bf16 %v1205_v20  ;;  %s1419_s22 = sshll.u32 %s1453_s30, 3 }
  0x13   : > { %983 = vmatpush3.msra.mxu0 %v563_v6  ;;  %v558_v18 = vld [vmem:[%s1443_s2 + $0x40] sm:$0xff]  ;;  %v1202_v19 = vld [vmem:[%s1173_s11 + $0x8] sm:$0x77]  ;;  %v366_v22 = vunpack.c.h.bf16 %v1196_v17  ;;  %v365_v23 = vunpack.c.l.bf16 %v1196_v17  ;;  %v573_v24 = vld [vmem:[%s1443_s2 + $0xb8] sm:$0xff]  ;;  %v372_v30 = vunpack.c.h.bf16 %v1208_v21  ;;  %v371_v46 = vunpack.c.l.bf16 %v1208_v21  ;;  %s348_s26 = scalar_lea.vmem %s1447_s6, %s1419_s22  ;;  %s352_s25 = scalar_lea.vmem %s1448_s7, %s1419_s22 }
  0x14   : > { %984 = vmatprep.subr.mxu0 %v578_v7  ;;  %v1216_v25 = vld [vmem:[%s1173_s11 + $0x20] sm:$0x77]  ;;  %v1219_v26 = vld [vmem:[%s1173_s11 + $0x28] sm:$0x77]  ;;  %v1222_v27 = vld [vmem:[%s1173_s11 + $0x30] sm:$0x77]  ;;  %v368_v28 = vunpack.c.h.bf16 %v1202_v19  ;;  %v367_v31 = vunpack.c.l.bf16 %v1202_v19  ;;  %s356_s10 = scalar_lea.vmem %s1449_s8, %s1419_s22 }
  0x15   : > { %985 = vmatpush3.msra.mxu0 %v562_v9  ;;  %v557_v32 = vld [vmem:[%s1443_s2 + $0x38] sm:$0xff]  ;;  %v374_v34 = vunpack.c.h.bf16 %v1216_v25  ;;  %v376_v35 = vunpack.c.h.bf16 %v1219_v26  ;;  %v378_v36 = vunpack.c.h.bf16 %v1222_v27  ;;  %v1238_v37 = vld [vmem:[%s1193_s24] sm:$0x77]  ;;  %v1241_v38 = vld [vmem:[%s1193_s24 + $0x8] sm:$0x77]  ;;  %v373_v53 = vunpack.c.l.bf16 %v1216_v25 }
  0x16   : > { %986 = vmatprep.subr.mxu0 %v577_v10  ;;  %v1232_v33 = vld [vmem:[%s1173_s11 + $0x38] sm:$0x77]  ;;  %v1246_v41 = vld [vmem:[%s1193_s24 + $0x10] sm:$0x77]  ;;  %v1252_v43 = vld [vmem:[%s1193_s24 + $0x20] sm:$0x77]  ;;  %v390_v44 = vunpack.c.h.bf16 %v1238_v37  ;;  %v392_v45 = vunpack.c.h.bf16 %v1241_v38 }
  0x17   : > { %987 = vmatpush3.msra.mxu0 %v561_v11  ;;  %v380_v40 = vunpack.c.h.bf16 %v1232_v33  ;;  %v1249_v42 = vld [vmem:[%s1193_s24 + $0x18] sm:$0x77]  ;;  %v1258_v47 = vld [vmem:[%s1193_s24 + $0x28] sm:$0x77]  ;;  %v1261_v48 = vld [vmem:[%s1193_s24 + $0x30] sm:$0x77]  ;;  %v394_v50 = vunpack.c.h.bf16 %v1246_v41  ;;  %v398_v52 = vunpack.c.h.bf16 %v1252_v43 }
  0x18   : > { %988 = vmatprep.subr.mxu0 %v576_v12  ;;  %v1264_v49 = vld [vmem:[%s1193_s24 + $0x38] sm:$0x77]  ;;  %v396_v51 = vunpack.c.h.bf16 %v1249_v42  ;;  %v572_v54 = vld [vmem:[%s1443_s2 + $0xb0] sm:$0xff]  ;;  %v400_v55 = vunpack.c.h.bf16 %v1258_v47  ;;  %v402_v56 = vunpack.c.h.bf16 %v1261_v48  ;;  %v406_v58 = vmul.f32 %v390_v44, %v366_v22  ;;  %v571_v2 = vld [vmem:[%s1443_s2 + $0xa8] sm:$0xff] }
  0x19   : > { %989 = vmatpush3.msra.mxu0 %v560_v13  ;;  %v404_v57 = vunpack.c.h.bf16 %v1264_v49  ;;  %v710_v59 = vld [vmem:[%s1445_s4 + $0x58] sm:$0xff]  ;;  %v556_v60 = vld [vmem:[%s1443_s2 + $0x30] sm:$0xff]  ;;  %v408_v61 = vmul.f32 %v392_v45, %v368_v28  ;;  %v410_v62 = vmul.f32 %v394_v50, %v370_v29  ;;  %v414_v0 = vmul.f32 %v398_v52, %v374_v34  ;;  %v555_v7 = vld [vmem:[%s1443_s2 + $0x28] sm:$0xff] }
  0x1a   : > { %990 = vmatprep.subr.mxu0 %v575_v14  ;;  %v412_v63 = vmul.f32 %v396_v51, %v372_v30  ;;  %v709_v1 = vld [vmem:[%s1445_s4 + $0x50] sm:$0xff]  ;;  %v416_v3 = vmul.f32 %v400_v55, %v376_v35  ;;  %v418_v4 = vmul.f32 %v402_v56, %v378_v36  ;;  %v429_v6 = vsel %vm421_vm0, %v406_v58, -inf  ;;  %1027 = vmatpush3.msra.mxu1 %v710_v59  ;;  %v708_v13 = vld [vmem:[%s1445_s4 + $0x48] sm:$0xff]  ;;  %v570_v14 = vld [vmem:[%s1443_s2 + $0xa0] sm:$0xff] }
  0x1b   : > { %991 = vmatpush3.msra.mxu0 %v559_v15  ;;  %v420_v5 = vmul.f32 %v404_v57, %v380_v40  ;;  %v430_v9 = vrot.slane %v429_v6, 4  ;;  %v443_v10 = vsel %vm421_vm0, %v408_v61, -inf  ;;  %v457_v11 = vsel %vm421_vm0, %v410_v62, -inf  ;;  %1028 = vmatprep.subr.mxu1 %v1077_v8  ;;  %v707_v34 = vld [vmem:[%s1445_s4 + $0x40] sm:$0xff]  ;;  %v569_v35 = vld [vmem:[%s1443_s2 + $0x98] sm:$0xff]  ;;  %v568_v57 = vld [vmem:[%s1443_s2 + $0x90] sm:$0xff] }
  0x1c   : > { %992 = vmatprep.subr.mxu0 %v574_v16  ;;  %v471_v12 = vsel %vm421_vm0, %v412_v63, -inf  ;;  %v444_v15 = vrot.slane %v443_v10, 4  ;;  %v458_v16 = vrot.slane %v457_v11, 4  ;;  %v485_v22 = vsel %vm421_vm0, %v414_v0, -inf  ;;  %1029 = vmatpush3.msra.mxu1 %v709_v1  ;;  %v553_v50 = vld [vmem:[%s1443_s2 + $0x18] sm:$0xff]  ;;  %v552_v62 = vld [vmem:[%s1443_s2 + $0x10] sm:$0xff] }
  0x1d   : > { %993 = vmatpush3.msra.mxu0 %v558_v18  ;;  %v472_v18 = vrot.slane %v471_v12, 4  ;;  %v431_v28 = vmax.f32 %v429_v6, %v430_v9  ;;  %v486_v29 = vrot.slane %v485_v22, 4  ;;  %v499_v30 = vsel %vm421_vm0, %v416_v3, -inf  ;;  %1030 = vmatprep.subr.mxu1 %v1077_v8  ;;  %v706_v56 = vld [vmem:[%s1445_s4 + $0x38] sm:$0xff]  ;;  %v705_v3 = vld [vmem:[%s1445_s4 + $0x30] sm:$0xff] }
  0x1e   : > { %994 = vmatprep.subr.mxu0 %v573_v24  ;;  %v554_v24 = vld [vmem:[%s1443_s2 + $0x20] sm:$0xff]  ;;  %v445_v36 = vmax.f32 %v443_v10, %v444_v15  ;;  %v459_v40 = vmax.f32 %v457_v11, %v458_v16  ;;  %v500_v45 = vrot.slane %v499_v30, 4  ;;  %1031 = vmatpush3.msra.mxu1 %v708_v13  ;;  %v527_v55 = vsel %vm421_vm0, %v420_v5, -inf  ;;  %v551_v10 = vld [vmem:[%s1443_s2 + $0x8] sm:$0xff] }
  0x1f   : > { %995 = vmatpush3.msra.mxu0 %v557_v32  ;;  %v513_v32 = vsel %vm421_vm0, %v418_v4, -inf  ;;  %v473_v44 = vmax.f32 %v471_v12, %v472_v18  ;;  %v432_v51 = vrot.slane %v431_v28, 2  ;;  %v487_v52 = vmax.f32 %v485_v22, %v486_v29  ;;  %1032 = vmatprep.subr.mxu1 %v1077_v8  ;;  %v567_v4 = vld [vmem:[%s1443_s2 + $0x88] sm:$0xff]  ;;  %v566_v16 = vld [vmem:[%s1443_s2 + $0x80] sm:$0xff] }
  0x20   : > { %996 = vmatprep.subr.mxu0 %v572_v54  ;;  %v514_v54 = vrot.slane %v513_v32, 4  ;;  %v446_v58 = vrot.slane %v445_v36, 2  ;;  %v460_v59 = vrot.slane %v459_v40, 2  ;;  %v501_v61 = vmax.f32 %v499_v30, %v500_v45  ;;  %1033 = vmatpush3.msra.mxu1 %v707_v34  ;;  %v704_v15 = vld [vmem:[%s1445_s4 + $0x28] sm:$0xff]  ;;  %v550_v29 = vld [vmem:[%s1443_s2] sm:$0xff] }
  0x21   : > { %997 = vmatpush3.msra.mxu0 %v556_v60  ;;  %v474_v60 = vrot.slane %v473_v44, 2  ;;  %v433_v63 = vmax.f32 %v431_v28, %v432_v51  ;;  %v488_v0 = vrot.slane %v487_v52, 2  ;;  %1034 = vmatprep.subr.mxu1 %v1077_v8  ;;  %vm795_vm10 = vcmask 31744  }
  0x22   : > { %998 = vmatprep.subr.mxu0 %v571_v2  ;;  %v515_v1 = vmax.f32 %v513_v32, %v514_v54  ;;  %v528_v2 = vrot.slane %v527_v55, 4  ;;  %v447_v5 = vmax.f32 %v445_v36, %v446_v58  ;;  %v461_v6 = vmax.f32 %v459_v40, %v460_v59  ;;  %1035 = vmatpush3.msra.mxu1 %v706_v56 }
  0x23   : > { %999 = vmatpush3.msra.mxu0 %v555_v7  ;;  %v475_v7 = vmax.f32 %v473_v44, %v474_v60  ;;  %v502_v9 = vrot.slane %v501_v61, 2  ;;  %v434_v11 = vrot.slane %v433_v63, 1  ;;  %v489_v12 = vmax.f32 %v487_v52, %v488_v0  ;;  %1036 = vmatprep.subr.mxu1 %v1077_v8 }
  0x24   : > { %1000 = vmatprep.subr.mxu0 %v570_v14  ;;  %v516_v13 = vrot.slane %v515_v1, 2  ;;  %v529_v14 = vmax.f32 %v527_v55, %v528_v2  ;;  %v448_v18 = vrot.slane %v447_v5, 1  ;;  %v462_v22 = vrot.slane %v461_v6, 1  ;;  %1037 = vmatpush3.msra.mxu1 %v705_v3 }
  0x25   : > { %1001 = vmatpush3.msra.mxu0 %v554_v24  ;;  %v476_v24 = vrot.slane %v475_v7, 1  ;;  %v503_v28 = vmax.f32 %v501_v61, %v502_v9  ;;  %v435_v30 = vmax.f32 %v433_v63, %v434_v11  ;;  %v490_v32 = vrot.slane %v489_v12, 1  ;;  %1038 = vmatprep.subr.mxu1 %v1077_v8 }
  0x26   : > { %1002 = vmatprep.subr.mxu0 %v569_v35  ;;  %v517_v34 = vmax.f32 %v515_v1, %v516_v13  ;;  %v530_v35 = vrot.slane %v529_v14, 2  ;;  %v449_v36 = vmax.f32 %v447_v5, %v448_v18  ;;  %v463_v40 = vmax.f32 %v461_v6, %v462_v22  ;;  %1039 = vmatpush3.msra.mxu1 %v704_v15 }
  0x27   : > { %1003 = vmatpush3.msra.mxu0 %v553_v50  ;;  %v477_v44 = vmax.f32 %v475_v7, %v476_v24  ;;  %v504_v45 = vrot.slane %v503_v28, 1  ;;  %v491_v50 = vmax.f32 %v489_v12, %v490_v32  ;;  %v535_v54 = vmax.f32 %v435_v30, 0.0  ;;  %1040 = vmatprep.subr.mxu1 %v1077_v8 }
  0x28   : > { %1004 = vmatprep.subr.mxu0 %v568_v57  ;;  %v518_v51 = vrot.slane %v517_v34, 1  ;;  %v531_v52 = vmax.f32 %v529_v14, %v530_v35  ;;  %v537_v56 = vmax.f32 %v449_v36, 0.0  ;;  %v539_v57 = vmax.f32 %v463_v40, 0.0 }
  0x29   : > { %1005 = vmatpush3.msra.mxu0 %v552_v62  ;;  %v505_v55 = vmax.f32 %v503_v28, %v504_v45  ;;  %v541_v58 = vmax.f32 %v477_v44, 0.0  ;;  %v543_v61 = vmax.f32 %v491_v50, 0.0  ;;  %v375_v62 = vunpack.c.l.bf16 %v1219_v26 }
  0x2a   : > { %1006 = vmatprep.subr.mxu0 %v567_v4  ;;  %v519_v59 = vmax.f32 %v517_v34, %v518_v51  ;;  %v532_v60 = vrot.slane %v531_v52, 1  ;;  %v619_v0 = vsel %vm605_vm1, %v537_v56, %v535_v54  ;;  %v377_v1 = vunpack.c.l.bf16 %v1222_v27 }
  0x2b   : > { %1007 = vmatpush3.msra.mxu0 %v551_v10  ;;  %v545_v63 = vmax.f32 %v505_v55, 0.0  ;;  %v379_v2 = vunpack.c.l.bf16 %v1232_v33  ;;  %v620_v5 = vsel %vm607_vm2, %v539_v57, %v619_v0  ;;  %v389_v6 = vunpack.c.l.bf16 %v1238_v37 }
  0x2c   : > { %1008 = vmatprep.subr.mxu0 %v566_v16  ;;  %v533_v3 = vmax.f32 %v531_v52, %v532_v60  ;;  %v547_v4 = vmax.f32 %v519_v59, 0.0  ;;  %v621_v7 = vsel %vm609_vm3, %v541_v58, %v620_v5  ;;  %v391_v9 = vunpack.c.l.bf16 %v1241_v38 }
  0x2d   : > { %1009 = vmatpush3.msra.mxu0 %v550_v29  ;;  %v393_v10 = vunpack.c.l.bf16 %v1246_v41  ;;  %v395_v26 = vunpack.c.l.bf16 %v1249_v42  ;;  %v622_v12 = vsel %vm611_vm4, %v543_v61, %v621_v7  ;;  %v397_v27 = vunpack.c.l.bf16 %v1252_v43 }
  0x2e   : > { %v549_v11 = vmax.f32 %v533_v3, 0.0  ;;  %v399_v33 = vunpack.c.l.bf16 %v1258_v47  ;;  %v623_v13 = vsel %vm613_vm5, %v545_v63, %v622_v12  ;;  %v401_v14 = vunpack.c.l.bf16 %v1261_v48 }
  0x2f   : > { %v403_v37 = vunpack.c.l.bf16 %v1264_v49  ;;  %v405_v38 = vmul.f32 %v389_v6, %v365_v23  ;;  %v624_v41 = vsel %vm615_vm6, %v547_v4, %v623_v13  ;;  %v407_v42 = vmul.f32 %v391_v9, %v367_v31 }
  0x30   : > { %v409_v15 = vmul.f32 %v393_v10, %v369_v39  ;;  %v411_v43 = vmul.f32 %v395_v26, %v371_v46  ;;  %v625_v47 = vsel %vm617_vm7, %v549_v11, %v624_v41  ;;  %v413_v48 = vmul.f32 %v397_v27, %v373_v53 }
  0x31   : > { %v415_v49 = vmul.f32 %v399_v33, %v375_v62  ;;  %v417_v16 = vmul.f32 %v401_v14, %v377_v1  ;;  %692 = vmatprep.mubr.f32.mxu0 %v625_v47  ;;  %v419_v17 = vmul.f32 %v403_v37, %v379_v2  ;;  %v422_v23 = vsel %vm421_vm0, %v405_v38, -inf }
  0x32   : > { %v436_v19 = vsel %vm421_vm0, %v407_v42, -inf  ;;  %v450_v31 = vsel %vm421_vm0, %v409_v15, -inf  ;;  %v423_v20 = vrot.slane %v422_v23, 4  ;;  %v464_v21 = vsel %vm421_vm0, %v411_v43, -inf }
  0x33   : > { %v437_v39 = vrot.slane %v436_v19, 4  ;;  %v451_v18 = vrot.slane %v450_v31, 4  ;;  %v465_v46 = vrot.slane %v464_v21, 4  ;;  %v478_v22 = vsel %vm421_vm0, %v413_v48, -inf }
  0x34   : > { %v492_v25 = vsel %vm421_vm0, %v415_v49, -inf  ;;  %v506_v53 = vsel %vm421_vm0, %v417_v16, -inf  ;;  %v424_v24 = vmax.f32 %v422_v23, %v423_v20  ;;  %v479_v30 = vrot.slane %v478_v22, 4 }
  0x35   : > { %v438_v28 = vmax.f32 %v436_v19, %v437_v39  ;;  %v452_v29 = vmax.f32 %v450_v31, %v451_v18  ;;  %v466_v32 = vmax.f32 %v464_v21, %v465_v46  ;;  %v493_v34 = vrot.slane %v492_v25, 4 }
  0x36   : > { %v507_v35 = vrot.slane %v506_v53, 4  ;;  %v520_v36 = vsel %vm421_vm0, %v419_v17, -inf  ;;  %v425_v40 = vrot.slane %v424_v24, 2  ;;  %v480_v50 = vmax.f32 %v478_v22, %v479_v30  ;;  %v703_v22 = vld [vmem:[%s1445_s4 + $0x20] sm:$0xff] }
  0x37   : > { %v439_v44 = vrot.slane %v438_v28, 2  ;;  %v453_v45 = vrot.slane %v452_v29, 2  ;;  %v467_v51 = vrot.slane %v466_v32, 2  ;;  %v494_v52 = vmax.f32 %v492_v25, %v493_v34  ;;  %1041 = vmatpush3.msra.mxu1 %v703_v22  ;;  %v702_v25 = vld [vmem:[%s1445_s4 + $0x18] sm:$0xff]  ;;  %v971_v34 = vld [vmem:[%s1444_s3] ss:$0 sm:$0xff] }
  0x38   : > { %v508_v54 = vmax.f32 %v506_v53, %v507_v35  ;;  %v521_v55 = vrot.slane %v520_v36, 4  ;;  %v426_v56 = vmax.f32 %v424_v24, %v425_v40  ;;  %v481_v59 = vrot.slane %v480_v50, 2  ;;  %1042 = vmatprep.subr.mxu1 %v1077_v8  ;;  %v701_v53 = vld [vmem:[%s1445_s4 + $0x10] sm:$0xff]  ;;  %v700_v24 = vld [vmem:[%s1445_s4 + $0x8] sm:$0xff] }
  0x39   : > { %v440_v57 = vmax.f32 %v438_v28, %v439_v44  ;;  %v454_v58 = vmax.f32 %v452_v29, %v453_v45  ;;  %v468_v60 = vmax.f32 %v466_v32, %v467_v51  ;;  %v495_v61 = vrot.slane %v494_v52, 2  ;;  %1043 = vmatpush3.msra.mxu1 %v702_v25  ;;  %v699_v28 = vld [vmem:[%s1445_s4] sm:$0xff] }
  0x3a   : > { %v509_v62 = vrot.slane %v508_v54, 2  ;;  %v522_v63 = vmax.f32 %v520_v36, %v521_v55  ;;  %v427_v0 = vrot.slane %v426_v56, 1  ;;  %v482_v3 = vmax.f32 %v480_v50, %v481_v59  ;;  %1044 = vmatprep.subr.mxu1 %v1077_v8  ;;  %v972_v29 = vld [vmem:[#allocation2] ss:$0 sm:$0xff] }
  0x3b   : > { %v441_v1 = vrot.slane %v440_v57, 1  ;;  %v455_v2 = vrot.slane %v454_v58, 1  ;;  %v469_v4 = vrot.slane %v468_v60, 1  ;;  %v496_v5 = vmax.f32 %v494_v52, %v495_v61  ;;  %1045 = vmatpush3.msra.mxu1 %v701_v53 }
  0x3c   : > { %v510_v6 = vmax.f32 %v508_v54, %v509_v62  ;;  %v523_v7 = vrot.slane %v522_v63, 2  ;;  %v428_v9 = vmax.f32 %v426_v56, %v427_v0  ;;  %v483_v11 = vrot.slane %v482_v3, 1  ;;  %1046 = vmatprep.subr.mxu1 %v1077_v8 }
  0x3d   : > { %v442_v10 = vmax.f32 %v440_v57, %v441_v1  ;;  %v456_v26 = vmax.f32 %v454_v58, %v455_v2  ;;  %v470_v12 = vmax.f32 %v468_v60, %v469_v4  ;;  %v497_v27 = vrot.slane %v496_v5, 1  ;;  %1047 = vmatpush3.msra.mxu1 %v700_v24 }
  0x3e   : > { %v511_v33 = vrot.slane %v510_v6, 1  ;;  %v524_v13 = vmax.f32 %v522_v63, %v523_v7  ;;  %v484_v14 = vmax.f32 %v482_v3, %v483_v11  ;;  %v534_v37 = vmax.f32 %v428_v9, 0.0  ;;  %1048 = vmatprep.subr.mxu1 %v1077_v8 }
  0x3f   : > { %v536_v38 = vmax.f32 %v442_v10, 0.0  ;;  %v538_v41 = vmax.f32 %v456_v26, 0.0  ;;  %v498_v42 = vmax.f32 %v496_v5, %v497_v27  ;;  %v540_v47 = vmax.f32 %v470_v12, 0.0  ;;  %1049 = vmatpush3.msra.mxu1 %v699_v28 }
  0x40   : > { %v512_v15 = vmax.f32 %v510_v6, %v511_v33  ;;  %v525_v43 = vrot.slane %v524_v13, 1  ;;  %v542_v48 = vmax.f32 %v484_v14, 0.0  ;;  %v1079_v30 = vmov 0  }
  0x41   : > { %v606_v49 = vsel %vm605_vm1, %v536_v38, %v534_v37  ;;  %v544_v17 = vmax.f32 %v498_v42, 0.0  ;;  %1064 = vset.pattern.permute.xlu0 %v1079_v30  ;;  %v809_v54 = vlaneseq  ;;  %vm828_vm13 = vcmask 7168  }
  0x42   : > { %v526_v16 = vmax.f32 %v524_v13, %v525_v43  ;;  %v546_v23 = vmax.f32 %v512_v15, 0.0  ;;  %v608_v19 = vsel %vm607_vm2, %v538_v41, %v606_v49  ;;  %718 = vperm.xlu0 %1064, %v972_v29  }
  0x43   : > { %v610_v31 = vsel %vm609_vm3, %v540_v47, %v608_v19  ;;  %v810_v55 = vand.u32 127, %v809_v54 }
  0x44   : > { %v548_v20 = vmax.f32 %v526_v16, 0.0  ;;  %v612_v39 = vsel %vm611_vm4, %v542_v48, %v610_v31 }
  0x45   : > { %v614_v18 = vsel %vm613_vm5, %v544_v17, %v612_v39 }
  0x46   : > { %v616_v21 = vsel %vm615_vm6, %v546_v23, %v614_v18 }
  0x47   : > { %v618_v46 = vsel %vm617_vm7, %v548_v20, %v616_v21 }
  0x48   : > { %693 = vmatmul.mubr.f32.vlgmr.msra.gmra.mxu0 %v618_v46 }
  0xbd   : > { %v719_v8 = vpop.permute.xlu0 %718 }
 0x108   : > { %v1010_v32 = vpop.f32.mrf.mxu0 }
 0x10a   : > { %v1011_v35 = vpop.f32.mrf.mxu0 }
 0x10b   : > { %v1012_v36 = vadd.f32 %v1011_v35, %v1010_v32 }
 0x10d   : > { %v695_v40 = vadd.f32 %v1012_v36, %v971_v34 }
 0x10f   : > { %v698_v44 = vmax.f32 %v695_v40, 0.0 }
 0x111   : > { %1051 = vmatmul.mubr.msk.f32.vlgmr.msra.gmra.mxu1 %vm721_vm9, %v698_v44 }
 0x1d1   : > { %v791_v45 = vpop.f32.mrf.mxu1 }
 0x1d2   : > { %v792_v50 = vadd.f32 %v791_v45, %v719_v8 }
 0x1d3   : > { %v1052_v51 = vpop.f32.mrf.mxu1 }
 0x1d4   : > { %v797_v52 = vsel %vm795_vm10, %v792_v50, -inf  ;;  %796 = vst.msk [vmem:[%s348_s26] sm:$0xff] %vm795_vm10, %v792_v50 }
 0x1d5   : > { %798 = vmax.xlane.f32.xlu0 %v797_v52 }
 0x25e   : > { %v799_v56 = vpop.xlane.xlu0 %798 }
 0x25f   : > { %v800_v57 = vsub.f32 %v792_v50, %v799_v56  ;;  %vm811_vm11 = vcmp.ge.f32.partialorder %v792_v50, %v799_v56 }
 0x260   : > { %v812_v58 = vsel %vm811_vm11, %v810_v55, 4 }
 0x261   : > { %v801_v59 = vmul.f32 1.442695, %v800_v57  ;;  %v813_v60 = vsel %vm795_vm10, %v812_v58, 2147483647 }
 0x262   : > { %v815_v61 = vshra.s32 %v813_v60, 16  ;;  %v814_v1 = vand.u32 65535, %v813_v60 }
 0x263   : > { %1065 = vpow2.f32 %v801_v59 }
 0x264   : > { %v817_v62 = vcvt.s32.f32 %v815_v61  ;;  %v816_v3 = vcvt.s32.f32 %v814_v1 }
 0x266   : > { %818 = vmin.xlane.f32.xlu1 %v817_v62 }
 0x270   : > { %v1066_v63 = vpop.eup %1065 }
 0x271   : > { %v803_v0 = vsel %vm795_vm10, %v1066_v63, 0.0 }
 0x272   : > { %804 = vadd.xlane.f32.xlu1 %v803_v0 }
 0x2ef   : > { %v819_v2 = vpop.xlane.xlu1 %818 }
 0x2f0   : > { %vm820_vm12 = vcmp.eq.f32.partialorder %v817_v62, %v819_v2  ;;  %v825_v9 = vcvt.f32.s32 %v819_v2 }
 0x2f1   : > { %v821_v4 = vsel %vm820_vm12, %v816_v3, inf }
 0x2f2   : > { %822 = vmin.xlane.f32.xlu1 %v821_v4  ;;  %v826_v26 = vshll.u32 %v825_v9, 16 }
 0x2fb   : > { %v805_v5 = vpop.xlane.xlu1 %804 }
 0x2fc   : > { %1067 = vrcp.f32 %v805_v5 }
 0x309   : > { %v1068_v6 = vpop.eup %1067 }
 0x30a   : > { %v807_v7 = vmul.f32 %v1068_v6, %v1066_v63 }
 0x30c   : > { %808 = vst.msk [vmem:[%s352_s25] sm:$0xff] %vm795_vm10, %v807_v7 }
 0x37b   : > { %v823_v10 = vpop.xlane.xlu1 %822 }
 0x37c   : > { %v824_v11 = vcvt.f32.s32 %v823_v10 }
 0x37e   : > { %v827_v12 = vadd.s32 %v826_v26, %v824_v11 }
 0x380   : > { %829 = vst.msk [vmem:[%s356_s10] sm:$0xff] %vm828_vm13, %v827_v12 }
 0x381 PF: > { %s21_s29 = sadd.s32 1, %s1075_s29  }
 0x382   : > { %p18_p5 = scmp.ge.s32.totalorder %s21_s29, 4  }
 0x384   :  { %20 = sbr.rel (!%p18_p5) target bundleno = 3 (0x3), region = 101 }

</bundles_post_ra>
